<compile_context>
chip_gen: v6e
topology: v6e:2x2x1
jax: 0.10.0
libtpu: 0.0.40
codegen_flags: <defaults>
</compile_context>

<pallas_src>
import math

import jax
import jax.numpy as jnp
import numpy as np
from jax.experimental import pallas as pl
from jax.experimental.pallas import tpu as pltpu


def _round_up(x, m):
    return (x + m - 1) // m * m


# ----------------------------------------------------------------------------
# Pallas kernel.  Grid = (batch 'parallel', encoder_layer 'arbitrary').
# ----------------------------------------------------------------------------
def _base_model_kernel(
    mix_ref,          # SMEM (2, K): row0 = gamma_tag*softmax(s_tag), row1 = dep
    bert_ref,         # VMEM (1, 1, L, D)  (bf16 or f32)
    tag_wt_ref,       # (D, T)    tag_mlp.weight^T
    tag_b_ref,        # (1, T)
    tag_emb_ref,      # (T, E)
    arc_wd_ref,       # (D, 2A)   rows of mlp_arc.weight^T matching dep_out
    arc_we_ref,       # (E, 2A)   rows matching tag_embed
    arc_b_ref,        # (1, 2A)
    lbl_wd_ref,       # (D, G+Lb) cols = [head(Lb), ones-col, 0-pad, dep(Lb)]
    lbl_we_ref,       # (E, G+Lb)
    lbl_b_ref,        # (1, G+Lb)
    arc_bm_ref,       # (A, A)    arc biaffine weight^T, non-bias rows
    arc_bb_ref,       # (1, A)    arc biaffine dep-side bias row
    lbl_bm_ref,       # (Lb, R*G) label biaffine, all labels batched + lane padded
    lbl_bb_ref,       # (1, R*G)  label biaffine dep-side bias rows
    tag_score_ref,    # out (1, L, T)
    arc_score_ref,    # out (1, L, L)     [b, head j, dep i]
    lbl_raw_ref,      # out (1, R, L, L)  [b, rel o, dep i, head j]
    tag_acc,          # VMEM scratch (L, D) f32  (ScalarMix accumulator, tag)
    dep_acc,          # VMEM scratch (L, D) f32  (ScalarMix accumulator, dep)
):
    k = pl.program_id(1)
    k_last = pl.num_programs(1) - 1

    # ---- ScalarMix (x2), streamed over the encoder-layer grid axis ----
    layer = bert_ref[0, 0].astype(jnp.float32)            # (L, D)

    @pl.when(k == 0)
    def _():
        tag_acc[...] = jnp.zeros_like(tag_acc)
        dep_acc[...] = jnp.zeros_like(dep_acc)

    tag_acc[...] += mix_ref[0, k] * layer
    dep_acc[...] += mix_ref[1, k] * layer

    # ---- the rest of the forward, once per batch element (last layer) ----
    @pl.when(k == k_last)
    def _():
        tag_out = tag_acc[...]
        dep_out = dep_acc[...]

        # tag MLP + softmax + tag embedding
        tag_score = (
            jnp.dot(tag_out, tag_wt_ref[...], preferred_element_type=jnp.float32)
            + tag_b_ref[...]
        )
        tag_score_ref[0] = tag_score

        m = jnp.max(tag_score, axis=-1, keepdims=True)
        e = jnp.exp(tag_score - m)
        probs = e * pl.reciprocal(jnp.sum(e, axis=-1, keepdims=True), approx=True)
        tag_embed = jnp.dot(probs, tag_emb_ref[...],
                            preferred_element_type=jnp.float32)

        # dep_embed = concat(dep_out, tag_embed); folded into split-weight matmuls
        arc_feat = (
            jnp.dot(dep_out, arc_wd_ref[...], preferred_element_type=jnp.float32)
            + jnp.dot(tag_embed, arc_we_ref[...], preferred_element_type=jnp.float32)
            + arc_b_ref[...]
        )
        arc_feat = jnp.maximum(arc_feat, 0.0)

        lbl_feat = (
            jnp.dot(dep_out, lbl_wd_ref[...], preferred_element_type=jnp.float32)
            + jnp.dot(tag_embed, lbl_we_ref[...], preferred_element_type=jnp.float32)
            + lbl_b_ref[...]
        )
        lbl_feat = jnp.maximum(lbl_feat, 0.0)

        A = arc_bm_ref.shape[0]
        arc_head = arc_feat[:, :A]
        arc_dep = arc_feat[:, A:]

        R = lbl_raw_ref.shape[1]
        G = lbl_bm_ref.shape[1] // R          # lane-padded per-label group width
        lbl_head_pad = lbl_feat[:, :G]        # [head, 1, 0...]: ones col from MLP bias
        lbl_dep = lbl_feat[:, G:]             # starts at a 128-multiple lane offset

        # ---- arc biaffine: bias=(True, False), out=1 ----
        affine_a = (
            jnp.dot(arc_dep, arc_bm_ref[...], preferred_element_type=jnp.float32)
            + arc_bb_ref[...]
        )
        # arc_score[j, i] = sum_d arc_head[j, d] * affine_a[i, d]
        arc_score_ref[0] = jax.lax.dot_general(
            arc_head, affine_a, (((1,), (1,)), ((), ())),
            preferred_element_type=jnp.float32,
        )

        # ---- label biaffine: bias=(True, True), out=R ----
        # ONE lane-dense matmul covering all R labels (N = R*G).
        aff = (
            jnp.dot(lbl_dep, lbl_bm_ref[...], preferred_element_type=jnp.float32)
            + lbl_bb_ref[...]
        )                                               # (L, R*G)
        head_t = lbl_head_pad.T                         # (G, L); transposed ONCE
        for o in range(R):                              # static unroll, aligned slices
            # standard (1,0) matmul; [dep i, head j] per label
            lbl_raw_ref[0, o] = jnp.dot(
                aff[:, o * G:(o + 1) * G], head_t,
                preferred_element_type=jnp.float32,
            )


# ----------------------------------------------------------------------------
# Wrapper: parameter re-layout (pure JAX glue, done once) + pallas_call.
# ----------------------------------------------------------------------------
def base_model_forward(bert_out, mask, params):
    """bert_out: (B, K, L, D) bf16 or f32; mask unused (matches reference forward)."""
    del mask
    B, K, L, D = bert_out.shape
    T, E = params["tag_embedding"].shape
    A2 = params["arc_w"].shape[0]
    A = A2 // 2
    Lb2 = params["lbl_w"].shape[0]
    Lb = Lb2 // 2
    R = params["lbl_bw"].shape[0] // (Lb + 1)
    G = _round_up(Lb + 1, 128)                  # lane-aligned per-label group width

    f32 = jnp.float32

    # ScalarMix: gamma * softmax(scalars), folded into one weight vector per mix.
    mix_w = jnp.stack(
        [
            params["scale_tag_gamma"] * jax.nn.softmax(params["scale_tag_s"]),
            params["scale_dep_gamma"] * jax.nn.softmax(params["scale_dep_s"]),
        ],
        axis=0,
    ).astype(f32)                                           # (2, K)

    tag_wt = params["tag_w"].T.astype(f32)                  # (D, T)
    tag_b = params["tag_b"].reshape(1, T).astype(f32)
    tag_emb = params["tag_embedding"].astype(f32)           # (T, E)

    arc_wt = params["arc_w"].T.astype(f32)                  # (D+E, 2A)
    arc_wd, arc_we = arc_wt[:D], arc_wt[D:]
    arc_b = params["arc_b"].reshape(1, A2).astype(f32)

    # label MLP, augmented: output columns = [head (Lb), 1, 0-pad, dep (Lb)]
    # (width G+Lb).  The always-one column (weights 0, bias 1, relu(1)=1)
    # supplies the head-side biaffine bias term without any in-kernel concat.
    lbl_wt = params["lbl_w"].T.astype(f32)                  # (D+E, 2Lb)
    lbl_wt_aug = jnp.concatenate(
        [lbl_wt[:, :Lb], jnp.zeros((D + E, G - Lb), f32), lbl_wt[:, Lb:]], axis=1)
    lbl_wd, lbl_we = lbl_wt_aug[:D], lbl_wt_aug[D:]
    lbl_b = params["lbl_b"].astype(f32)
    lbl_b_aug = jnp.concatenate(
        [lbl_b[:Lb], jnp.ones((1,), f32), jnp.zeros((G - Lb - 1,), f32), lbl_b[Lb:]]
    ).reshape(1, G + Lb)

    # arc biaffine Linear weight (A, A+1): split off the dep-side bias column.
    arc_bw = params["arc_bw"].astype(f32)
    arc_bm = arc_bw[:, :A].T                                # (A, A)
    arc_bb = arc_bw[:, A].reshape(1, A)                     # (1, A)

    # label biaffine weight (R*(Lb+1), Lb+1), row = o*(Lb+1)+d2, col = d1.
    # Batched into one (Lb, R*G) matrix + (1, R*G) bias row; each label's
    # (Lb+1) columns are zero-padded to G so kernel slices are lane aligned.
    w3 = params["lbl_bw"].reshape(R, Lb + 1, Lb + 1).astype(f32)   # [o, d2, d1]
    pad = G - (Lb + 1)
    lbl_bm = jnp.pad(jnp.transpose(w3[:, :, :Lb], (2, 0, 1)),      # [d1, o, d2]
                     ((0, 0), (0, 0), (0, pad))).reshape(Lb, R * G)
    lbl_bb = jnp.pad(w3[:, :, Lb], ((0, 0), (0, pad))).reshape(1, R * G)

    out_shapes = (
        jax.ShapeDtypeStruct((B, L, T), f32),
        jax.ShapeDtypeStruct((B, L, L), f32),
        jax.ShapeDtypeStruct((B, R, L, L), f32),
    )

    def _full(x):
        nd = x.ndim
        return pl.BlockSpec(x.shape, lambda b, k, nd=nd: (0,) * nd)

    weights = (tag_wt, tag_b, tag_emb,
               arc_wd, arc_we, arc_b,
               lbl_wd, lbl_we, lbl_b_aug,
               arc_bm, arc_bb,
               lbl_bm, lbl_bb)

    grid_spec = pltpu.PrefetchScalarGridSpec(
        num_scalar_prefetch=0,
        grid=(B, K),
        in_specs=[
            pl.BlockSpec(memory_space=pltpu.MemorySpace.SMEM),      # mix_w
            pl.BlockSpec((1, 1, L, D), lambda b, k: (b, k, 0, 0)),  # bert_out (streamed)
        ] + [_full(w) for w in weights],
        out_specs=[
            pl.BlockSpec((1, L, T), lambda b, k: (b, 0, 0)),
            pl.BlockSpec((1, L, L), lambda b, k: (b, 0, 0)),
            pl.BlockSpec((1, R, L, L), lambda b, k: (b, 0, 0, 0)),
        ],
        scratch_shapes=[
            pltpu.VMEM((L, D), f32),    # tag ScalarMix accumulator
            pltpu.VMEM((L, D), f32),    # dep ScalarMix accumulator
        ],
    )

    # Explicit scoped-VMEM budget sized from the resident blocks (2x headroom).
    def _b(*shapes):
        return 4 * sum(int(np.prod(s)) for s in shapes)
    resident = (
        _b(*(w.shape for w in weights))
        + 2 * L * D * bert_out.dtype.itemsize * 2               # bert block, dbl-buffered
        + 2 * _b((L, T), (L, L), (R, L, L))                     # output blocks, dbl-buffered
        + _b((L, D), (L, D))                                    # scratch accumulators
        + _b((L, R * G), (L, G + Lb), (L, A2), (G, L))          # main temporaries
    )
    vmem_limit = int(min(64 * 2**20, max(16 * 2**20, 2 * resident)))

    tag_score, arc_score, lbl_raw = pl.pallas_call(
        _base_model_kernel,
        out_shape=out_shapes,
        grid_spec=grid_spec,
        compiler_params=pltpu.CompilerParams(
            dimension_semantics=("parallel", "arbitrary"),
            vmem_limit_bytes=vmem_limit,
        ),
    )(mix_w, bert_out, *weights)

    # lbl_raw is [b, rel, dep, head]; reference layout is [b, head, dep, rel].
    # (A consumer that accepts (B, R, L, L) directly can skip this transpose.)
    lbl_score = jnp.transpose(lbl_raw, (0, 3, 2, 1))
    return tag_score, arc_score, lbl_score


# ----------------------------------------------------------------------------
# Plain-JAX reference (mirrors the PyTorch forward) for verification.
# ----------------------------------------------------------------------------
def reference_forward(bert_out, params):
    w_tag = jax.nn.softmax(params["scale_tag_s"])
    w_dep = jax.nn.softmax(params["scale_dep_s"])
    tag_out = params["scale_tag_gamma"] * jnp.einsum("k,bkld->bld", w_tag, bert_out)
    dep_out = params["scale_dep_gamma"] * jnp.einsum("k,bkld->bld", w_dep, bert_out)

    tag_score = tag_out @ params["tag_w"].T + params["tag_b"]
    probs = jax.nn.softmax(tag_score, axis=-1)
    tag_embed = probs @ params["tag_embedding"]
    dep_embed = jnp.concatenate([dep_out, tag_embed], axis=-1)

    arc_feat = jax.nn.relu(dep_embed @ params["arc_w"].T + params["arc_b"])
    lbl_feat = jax.nn.relu(dep_embed @ params["lbl_w"].T + params["lbl_b"])
    A = arc_feat.shape[-1] // 2
    arc_head, arc_dep = arc_feat[..., :A], arc_feat[..., A:]
    Lb = lbl_feat.shape[-1] // 2
    lbl_head, lbl_dep = lbl_feat[..., :Lb], lbl_feat[..., Lb:]

    B, L, _ = arc_dep.shape
    ones = jnp.ones((B, L, 1), jnp.float32)

    # arc Biaffine: bias=(True, False), out=1
    in1 = jnp.concatenate([arc_dep, ones], -1)              # (B, L, A+1)
    affine = in1 @ params["arc_bw"].T                       # (B, L, A)
    arc_score = jnp.einsum("bia,bja->bji", affine, arc_head)

    # label Biaffine: bias=(True, True), out=R
    R = params["lbl_bw"].shape[0] // (Lb + 1)
    in1l = jnp.concatenate([lbl_dep, ones], -1)
    in2l = jnp.concatenate([lbl_head, ones], -1)
    aff = (in1l @ params["lbl_bw"].T).reshape(B, L * R, Lb + 1)
    lbl_score = jnp.einsum("brd,bjd->bjr", aff, in2l).reshape(B, L, L, R)
    return tag_score, arc_score, lbl_score


# ----------------------------------------------------------------------------
# Deterministic parameter init (synthetic, no checkpoint load).
# ----------------------------------------------------------------------------
def _xavier_uniform(key, shape):
    fan_out, fan_in = shape
    bound = math.sqrt(6.0 / (fan_in + fan_out))
    return jax.random.uniform(key, shape, jnp.float32, -bound, bound)


def init_params(key, *, d_model, tag_size, tag_embed_dim, arc_mlp, label_mlp,
                rel_size, encoder_layer):
    keys = jax.random.split(key, 12)
    F = d_model + tag_embed_dim
    tag_embedding = _xavier_uniform(keys[0], (tag_size, tag_embed_dim))
    tag_embedding = tag_embedding.at[0].set(0.0)            # tag_embedding[0] = 0
    params = {
        "tag_embedding": tag_embedding,
        "tag_w": _xavier_uniform(keys[1], (tag_size, d_model)),
        "tag_b": 0.01 * jax.random.normal(keys[2], (tag_size,), jnp.float32),
        "arc_w": 0.1 * jax.random.normal(keys[3], (2 * arc_mlp, F), jnp.float32),
        "arc_b": 0.01 * jax.random.normal(keys[4], (2 * arc_mlp,), jnp.float32),
        "lbl_w": 0.1 * jax.random.normal(keys[5], (2 * label_mlp, F), jnp.float32),
        "lbl_b": 0.01 * jax.random.normal(keys[6], (2 * label_mlp,), jnp.float32),
        "arc_bw": 0.1 * jax.random.normal(keys[7], (arc_mlp, arc_mlp + 1), jnp.float32),
        "lbl_bw": 0.1 * jax.random.normal(
            keys[8], (rel_size * (label_mlp + 1), label_mlp + 1), jnp.float32),
        "scale_tag_s": 0.1 * jax.random.normal(keys[9], (encoder_layer,), jnp.float32),
        "scale_dep_s": 0.1 * jax.random.normal(keys[10], (encoder_layer,), jnp.float32),
        "scale_tag_gamma": jnp.float32(1.0),
        "scale_dep_gamma": jnp.float32(1.0),
    }
    return params


if __name__ == "__main__":
    # Small deterministic config
    B, K, L, D = 2, 4, 8, 32          # batch, encoder_layer, seq_len, d_model
    tag_size, tag_embed_dim = 8, 8
    arc_mlp, label_mlp, rel_size = 16, 16, 4

    key = jax.random.PRNGKey(0)
    k_bert, k_param = jax.random.split(key)
    bert_f32 = jax.random.normal(k_bert, (B, K, L, D), jnp.float32)
    bert_out = bert_f32.astype(jnp.bfloat16)   # bf16 activations: half the HBM traffic
    mask = jnp.ones((B, L), jnp.float32)       # unused in forward (as in reference)

    params = init_params(
        k_param, d_model=D, tag_size=tag_size, tag_embed_dim=tag_embed_dim,
        arc_mlp=arc_mlp, label_mlp=label_mlp, rel_size=rel_size, encoder_layer=K,
    )

    fwd = jax.jit(base_model_forward)
    tag_score, arc_score, lbl_score = jax.block_until_ready(
        fwd(bert_out, mask, params)
    )

    # sanity check against a plain-JAX reference on the same (bf16-quantized) input
    ref_tag, ref_arc, ref_lbl = reference_forward(bert_out.astype(jnp.float32), params)
    np.testing.assert_allclose(np.asarray(tag_score), np.asarray(ref_tag),
                               rtol=5e-2, atol=5e-2)
    np.testing.assert_allclose(np.asarray(arc_score), np.asarray(ref_arc),
                               rtol=5e-2, atol=5e-2)
    np.testing.assert_allclose(np.asarray(lbl_score), np.asarray(ref_lbl),
                               rtol=5e-2, atol=5e-2)

    assert tag_score.shape == (B, L, tag_size)
    assert arc_score.shape == (B, L, L)
    assert lbl_score.shape == (B, L, L, rel_size)

    # TODO(synk): tag_loss / tag_decode use a CRF module not constructed in the
    # reference __init__; they are not part of forward and are not implemented.
    print("KERNEL_OK")
</pallas_src>

<mosaic_0001>
module attributes {stable_mosaic.version = 11 : i64} {
  func.func @_base_model_kernel(%arg0: i32, %arg1: i32, %arg2: memref<2x4xf32, #tpu.memory_space<smem>>, %arg3: memref<1x1x8x32xbf16, #tpu.memory_space<vmem>>, %arg4: memref<32x8xf32, #tpu.memory_space<vmem>>, %arg5: memref<1x8xf32, #tpu.memory_space<vmem>>, %arg6: memref<8x8xf32, #tpu.memory_space<vmem>>, %arg7: memref<32x32xf32, #tpu.memory_space<vmem>>, %arg8: memref<8x32xf32, #tpu.memory_space<vmem>>, %arg9: memref<1x32xf32, #tpu.memory_space<vmem>>, %arg10: memref<32x144xf32, #tpu.memory_space<vmem>>, %arg11: memref<8x144xf32, #tpu.memory_space<vmem>>, %arg12: memref<1x144xf32, #tpu.memory_space<vmem>>, %arg13: memref<16x16xf32, #tpu.memory_space<vmem>>, %arg14: memref<1x16xf32, #tpu.memory_space<vmem>>, %arg15: memref<16x512xf32, #tpu.memory_space<vmem>>, %arg16: memref<1x512xf32, #tpu.memory_space<vmem>>, %arg17: memref<1x8x8xf32, #tpu.memory_space<vmem>>, %arg18: memref<1x8x8xf32, #tpu.memory_space<vmem>>, %arg19: memref<1x4x8x8xf32, #tpu.memory_space<vmem>>, %arg20: memref<8x32xf32, #tpu.memory_space<vmem>>, %arg21: memref<8x32xf32, #tpu.memory_space<vmem>>) attributes {dimension_semantics = [#tpu.dimension_semantics<parallel>, #tpu.dimension_semantics<arbitrary>], iteration_bounds = array<i64: 2, 4>, scalar_prefetch = 0 : i64, scratch_operands = 2 : i64, tpu.core_type = #tpu.core_type<tc>, window_params = [{transform_indices = @transform_0, window_bounds = array<i64: 2, 4>}, {transform_indices = @transform_1, window_bounds = array<i64: 1, 1, 8, 32>}, {pipeline_mode = #tpu.pipeline_mode<synchronous>, transform_indices = @transform_2, window_bounds = array<i64: 32, 8>}, {pipeline_mode = #tpu.pipeline_mode<synchronous>, transform_indices = @transform_3, window_bounds = array<i64: 1, 8>}, {pipeline_mode = #tpu.pipeline_mode<synchronous>, transform_indices = @transform_4, window_bounds = array<i64: 8, 8>}, {pipeline_mode = #tpu.pipeline_mode<synchronous>, transform_indices = @transform_5, window_bounds = array<i64: 32, 32>}, {pipeline_mode = #tpu.pipeline_mode<synchronous>, transform_indices = @transform_6, window_bounds = array<i64: 8, 32>}, {pipeline_mode = #tpu.pipeline_mode<synchronous>, transform_indices = @transform_7, window_bounds = array<i64: 1, 32>}, {pipeline_mode = #tpu.pipeline_mode<synchronous>, transform_indices = @transform_8, window_bounds = array<i64: 32, 144>}, {pipeline_mode = #tpu.pipeline_mode<synchronous>, transform_indices = @transform_9, window_bounds = array<i64: 8, 144>}, {pipeline_mode = #tpu.pipeline_mode<synchronous>, transform_indices = @transform_10, window_bounds = array<i64: 1, 144>}, {pipeline_mode = #tpu.pipeline_mode<synchronous>, transform_indices = @transform_11, window_bounds = array<i64: 16, 16>}, {pipeline_mode = #tpu.pipeline_mode<synchronous>, transform_indices = @transform_12, window_bounds = array<i64: 1, 16>}, {pipeline_mode = #tpu.pipeline_mode<synchronous>, transform_indices = @transform_13, window_bounds = array<i64: 16, 512>}, {pipeline_mode = #tpu.pipeline_mode<synchronous>, transform_indices = @transform_14, window_bounds = array<i64: 1, 512>}, {transform_indices = @transform_15, window_bounds = array<i64: 1, 8, 8>}, {transform_indices = @transform_16, window_bounds = array<i64: 1, 8, 8>}, {transform_indices = @transform_17, window_bounds = array<i64: 1, 4, 8, 8>}]} {
    %c0 = arith.constant 0 : index
    %c0_0 = arith.constant 0 : index
    %c0_1 = arith.constant 0 : index
    %c0_2 = arith.constant 0 : index
    %0 = vector.load %arg3[%c0, %c0_0, %c0_1, %c0_2] : memref<1x1x8x32xbf16, #tpu.memory_space<vmem>>, vector<1x1x8x32xbf16>
    %1 = vector.shape_cast %0 : vector<1x1x8x32xbf16> to vector<8x32xbf16>
    %2 = arith.extf %1 : vector<8x32xbf16> to vector<8x32xf32>
    %c0_i32 = arith.constant 0 : i32
    %3 = arith.cmpi eq, %arg1, %c0_i32 : i32
    %4 = arith.extui %3 : i1 to i32
    %c0_i32_3 = arith.constant 0 : i32
    %5 = arith.cmpi ne, %4, %c0_i32_3 : i32
    scf.if %5 {
      %cst = arith.constant 0.000000e+00 : f32
      %23 = vector.broadcast %cst : f32 to vector<8x32xf32>
      %c0_14 = arith.constant 0 : index
      %c0_15 = arith.constant 0 : index
      %24 = vector.load %arg20[%c0_14, %c0_15] : memref<8x32xf32, #tpu.memory_space<vmem>>, vector<8x32xf32>
      tpu.vector_store %arg20[%c0_14, %c0_15], %23 {strides = array<i32>} : memref<8x32xf32, #tpu.memory_space<vmem>>, vector<8x32xf32>,
      %cst_16 = arith.constant 0.000000e+00 : f32
      %25 = vector.broadcast %cst_16 : f32 to vector<8x32xf32>
      %c0_17 = arith.constant 0 : index
      %c0_18 = arith.constant 0 : index
      %26 = vector.load %arg21[%c0_17, %c0_18] : memref<8x32xf32, #tpu.memory_space<vmem>>, vector<8x32xf32>
      tpu.vector_store %arg21[%c0_17, %c0_18], %25 {strides = array<i32>} : memref<8x32xf32, #tpu.memory_space<vmem>>, vector<8x32xf32>,
    } else {
    }
    %c0_4 = arith.constant 0 : index
    %c0_5 = arith.constant 0 : index
    %6 = vector.load %arg20[%c0_4, %c0_5] : memref<8x32xf32, #tpu.memory_space<vmem>>, vector<8x32xf32>
    %c0_6 = arith.constant 0 : index
    %7 = arith.index_cast %arg1 : i32 to index
    %8 = memref.load %arg2[%c0_6, %7] : memref<2x4xf32, #tpu.memory_space<smem>>
    %9 = vector.broadcast %8 : f32 to vector<8x32xf32>
    %10 = arith.mulf %9, %2 : vector<8x32xf32>
    %11 = arith.addf %6, %10 : vector<8x32xf32>
    %c0_7 = arith.constant 0 : index
    %c0_8 = arith.constant 0 : index
    %12 = vector.load %arg20[%c0_7, %c0_8] : memref<8x32xf32, #tpu.memory_space<vmem>>, vector<8x32xf32>
    tpu.vector_store %arg20[%c0_7, %c0_8], %11 {strides = array<i32>} : memref<8x32xf32, #tpu.memory_space<vmem>>, vector<8x32xf32>,
    %c0_9 = arith.constant 0 : index
    %c0_10 = arith.constant 0 : index
    %13 = vector.load %arg21[%c0_9, %c0_10] : memref<8x32xf32, #tpu.memory_space<vmem>>, vector<8x32xf32>
    %c1 = arith.constant 1 : index
    %14 = arith.index_cast %arg1 : i32 to index
    %15 = memref.load %arg2[%c1, %14] : memref<2x4xf32, #tpu.memory_space<smem>>
    %16 = vector.broadcast %15 : f32 to vector<8x32xf32>
    %17 = arith.mulf %16, %2 : vector<8x32xf32>
    %18 = arith.addf %13, %17 : vector<8x32xf32>
    %c0_11 = arith.constant 0 : index
    %c0_12 = arith.constant 0 : index
    %19 = vector.load %arg21[%c0_11, %c0_12] : memref<8x32xf32, #tpu.memory_space<vmem>>, vector<8x32xf32>
    tpu.vector_store %arg21[%c0_11, %c0_12], %18 {strides = array<i32>} : memref<8x32xf32, #tpu.memory_space<vmem>>, vector<8x32xf32>,
    %c3_i32 = arith.constant 3 : i32
    %20 = arith.cmpi eq, %arg1, %c3_i32 : i32
    %21 = arith.extui %20 : i1 to i32
    %c0_i32_13 = arith.constant 0 : i32
    %22 = arith.cmpi ne, %21, %c0_i32_13 : i32
    scf.if %22 {
      %c0_14 = arith.constant 0 : index
      %c0_15 = arith.constant 0 : index
      %23 = vector.load %arg20[%c0_14, %c0_15] : memref<8x32xf32, #tpu.memory_space<vmem>>, vector<8x32xf32>
      %c0_16 = arith.constant 0 : index
      %c0_17 = arith.constant 0 : index
      %24 = vector.load %arg21[%c0_16, %c0_17] : memref<8x32xf32, #tpu.memory_space<vmem>>, vector<8x32xf32>
      %c0_18 = arith.constant 0 : index
      %c0_19 = arith.constant 0 : index
      %25 = vector.load %arg4[%c0_18, %c0_19] : memref<32x8xf32, #tpu.memory_space<vmem>>, vector<32x8xf32>
      %cst = arith.constant dense<0.000000e+00> : vector<8x8xf32>
      %26 = tpu.matmul %23, %25, %cst {dimension_numbers = #tpu.dot_dimension_numbers<[1], [0], [0], [1], [0, 0, 1, 1], [], []>} : vector<8x32xf32>, vector<32x8xf32>, vector<8x8xf32> -> vector<8x8xf32>
      %c0_20 = arith.constant 0 : index
      %c0_21 = arith.constant 0 : index
      %27 = vector.load %arg5[%c0_20, %c0_21] : memref<1x8xf32, #tpu.memory_space<vmem>>, vector<1x8xf32>
      %28 = vector.broadcast %27 : vector<1x8xf32> to vector<8x8xf32>
      %29 = arith.addf %26, %28 : vector<8x8xf32>
      %c0_22 = arith.constant 0 : index
      %c0_23 = arith.constant 0 : index
      %c0_24 = arith.constant 0 : index
      %30 = vector.load %arg17[%c0_22, %c0_23, %c0_24] : memref<1x8x8xf32, #tpu.memory_space<vmem>>, vector<1x8x8xf32>
      %31 = vector.shape_cast %30 : vector<1x8x8xf32> to vector<8x8xf32>
      %32 = vector.shape_cast %29 : vector<8x8xf32> to vector<1x8x8xf32>
      tpu.vector_store %arg17[%c0_22, %c0_23, %c0_24], %32 {strides = array<i32>} : memref<1x8x8xf32, #tpu.memory_space<vmem>>, vector<1x8x8xf32>,
      %cst_25 = arith.constant dense<0xFF800000> : vector<8xf32>
      %33 = vector.multi_reduction <maximumf>, %29, %cst_25 [1] : vector<8x8xf32> to vector<8xf32>
      %34 = vector.shape_cast %33 : vector<8xf32> to vector<8x1xf32>
      %35 = vector.broadcast %34 : vector<8x1xf32> to vector<8x8xf32>
      %36 = arith.subf %29, %35 : vector<8x8xf32>
      %37 = math.exp %36 : vector<8x8xf32>
      %cst_26 = arith.constant dense<0.000000e+00> : vector<8xf32>
      %38 = vector.multi_reduction <add>, %37, %cst_26 [1] : vector<8x8xf32> to vector<8xf32>
      %39 = vector.shape_cast %38 : vector<8xf32> to vector<8x1xf32>
      %40 = tpu.reciprocal %39 {approx = true} : vector<8x1xf32> -> vector<8x1xf32>
      %41 = vector.broadcast %40 : vector<8x1xf32> to vector<8x8xf32>
      %42 = arith.mulf %37, %41 : vector<8x8xf32>
      %c0_27 = arith.constant 0 : index
      %c0_28 = arith.constant 0 : index
      %43 = vector.load %arg6[%c0_27, %c0_28] : memref<8x8xf32, #tpu.memory_space<vmem>>, vector<8x8xf32>
      %cst_29 = arith.constant dense<0.000000e+00> : vector<8x8xf32>
      %44 = tpu.matmul %42, %43, %cst_29 {dimension_numbers = #tpu.dot_dimension_numbers<[1], [0], [0], [1], [0, 0, 1, 1], [], []>} : vector<8x8xf32>, vector<8x8xf32>, vector<8x8xf32> -> vector<8x8xf32>
      %c0_30 = arith.constant 0 : index
      %c0_31 = arith.constant 0 : index
      %45 = vector.load %arg7[%c0_30, %c0_31] : memref<32x32xf32, #tpu.memory_space<vmem>>, vector<32x32xf32>
      %cst_32 = arith.constant dense<0.000000e+00> : vector<8x32xf32>
      %46 = tpu.matmul %24, %45, %cst_32 {dimension_numbers = #tpu.dot_dimension_numbers<[1], [0], [0], [1], [0, 0, 1, 1], [], []>} : vector<8x32xf32>, vector<32x32xf32>, vector<8x32xf32> -> vector<8x32xf32>
      %c0_33 = arith.constant 0 : index
      %c0_34 = arith.constant 0 : index
      %47 = vector.load %arg8[%c0_33, %c0_34] : memref<8x32xf32, #tpu.memory_space<vmem>>, vector<8x32xf32>
      %cst_35 = arith.constant dense<0.000000e+00> : vector<8x32xf32>
      %48 = tpu.matmul %44, %47, %cst_35 {dimension_numbers = #tpu.dot_dimension_numbers<[1], [0], [0], [1], [0, 0, 1, 1], [], []>} : vector<8x8xf32>, vector<8x32xf32>, vector<8x32xf32> -> vector<8x32xf32>
      %49 = arith.addf %46, %48 : vector<8x32xf32>
      %c0_36 = arith.constant 0 : index
      %c0_37 = arith.constant 0 : index
      %50 = vector.load %arg9[%c0_36, %c0_37] : memref<1x32xf32, #tpu.memory_space<vmem>>, vector<1x32xf32>
      %51 = vector.broadcast %50 : vector<1x32xf32> to vector<8x32xf32>
      %52 = arith.addf %49, %51 : vector<8x32xf32>
      %cst_38 = arith.constant 0.000000e+00 : f32
      %53 = vector.broadcast %cst_38 : f32 to vector<8x32xf32>
      %54 = arith.maximumf %52, %53 : vector<8x32xf32>
      %c0_39 = arith.constant 0 : index
      %c0_40 = arith.constant 0 : index
      %55 = vector.load %arg10[%c0_39, %c0_40] : memref<32x144xf32, #tpu.memory_space<vmem>>, vector<32x144xf32>
      %cst_41 = arith.constant dense<0.000000e+00> : vector<8x144xf32>
      %56 = tpu.matmul %24, %55, %cst_41 {dimension_numbers = #tpu.dot_dimension_numbers<[1], [0], [0], [1], [0, 0, 1, 1], [], []>} : vector<8x32xf32>, vector<32x144xf32>, vector<8x144xf32> -> vector<8x144xf32>
      %c0_42 = arith.constant 0 : index
      %c0_43 = arith.constant 0 : index
      %57 = vector.load %arg11[%c0_42, %c0_43] : memref<8x144xf32, #tpu.memory_space<vmem>>, vector<8x144xf32>
      %cst_44 = arith.constant dense<0.000000e+00> : vector<8x144xf32>
      %58 = tpu.matmul %44, %57, %cst_44 {dimension_numbers = #tpu.dot_dimension_numbers<[1], [0], [0], [1], [0, 0, 1, 1], [], []>} : vector<8x8xf32>, vector<8x144xf32>, vector<8x144xf32> -> vector<8x144xf32>
      %59 = arith.addf %56, %58 : vector<8x144xf32>
      %c0_45 = arith.constant 0 : index
      %c0_46 = arith.constant 0 : index
      %60 = vector.load %arg12[%c0_45, %c0_46] : memref<1x144xf32, #tpu.memory_space<vmem>>, vector<1x144xf32>
      %61 = vector.broadcast %60 : vector<1x144xf32> to vector<8x144xf32>
      %62 = arith.addf %59, %61 : vector<8x144xf32>
      %cst_47 = arith.constant 0.000000e+00 : f32
      %63 = vector.broadcast %cst_47 : f32 to vector<8x144xf32>
      %64 = arith.maximumf %62, %63 : vector<8x144xf32>
      %65 = vector.extract_strided_slice %54 {offsets = [0, 0], sizes = [8, 16], strides = [1, 1]} : vector<8x32xf32> to vector<8x16xf32>
      %66 = vector.extract_strided_slice %54 {offsets = [0, 16], sizes = [8, 16], strides = [1, 1]} : vector<8x32xf32> to vector<8x16xf32>
      %67 = vector.extract_strided_slice %64 {offsets = [0, 0], sizes = [8, 128], strides = [1, 1]} : vector<8x144xf32> to vector<8x128xf32>
      %68 = vector.extract_strided_slice %64 {offsets = [0, 128], sizes = [8, 16], strides = [1, 1]} : vector<8x144xf32> to vector<8x16xf32>
      %c0_48 = arith.constant 0 : index
      %c0_49 = arith.constant 0 : index
      %69 = vector.load %arg13[%c0_48, %c0_49] : memref<16x16xf32, #tpu.memory_space<vmem>>, vector<16x16xf32>
      %cst_50 = arith.constant dense<0.000000e+00> : vector<8x16xf32>
      %70 = tpu.matmul %66, %69, %cst_50 {dimension_numbers = #tpu.dot_dimension_numbers<[1], [0], [0], [1], [0, 0, 1, 1], [], []>} : vector<8x16xf32>, vector<16x16xf32>, vector<8x16xf32> -> vector<8x16xf32>
      %c0_51 = arith.constant 0 : index
      %c0_52 = arith.constant 0 : index
      %71 = vector.load %arg14[%c0_51, %c0_52] : memref<1x16xf32, #tpu.memory_space<vmem>>, vector<1x16xf32>
      %72 = vector.broadcast %71 : vector<1x16xf32> to vector<8x16xf32>
      %73 = arith.addf %70, %72 : vector<8x16xf32>
      %cst_53 = arith.constant dense<0.000000e+00> : vector<8x8xf32>
      %74 = tpu.matmul %65, %73, %cst_53 {dimension_numbers = #tpu.dot_dimension_numbers<[1], [1], [0], [0], [0, 0, 1, 0], [], []>} : vector<8x16xf32>, vector<8x16xf32>, vector<8x8xf32> -> vector<8x8xf32>
      %c0_54 = arith.constant 0 : index
      %c0_55 = arith.constant 0 : index
      %c0_56 = arith.constant 0 : index
      %75 = vector.load %arg18[%c0_54, %c0_55, %c0_56] : memref<1x8x8xf32, #tpu.memory_space<vmem>>, vector<1x8x8xf32>
      %76 = vector.shape_cast %75 : vector<1x8x8xf32> to vector<8x8xf32>
      %77 = vector.shape_cast %74 : vector<8x8xf32> to vector<1x8x8xf32>
      tpu.vector_store %arg18[%c0_54, %c0_55, %c0_56], %77 {strides = array<i32>} : memref<1x8x8xf32, #tpu.memory_space<vmem>>, vector<1x8x8xf32>,
      %c0_57 = arith.constant 0 : index
      %c0_58 = arith.constant 0 : index
      %78 = vector.load %arg15[%c0_57, %c0_58] : memref<16x512xf32, #tpu.memory_space<vmem>>, vector<16x512xf32>
      %cst_59 = arith.constant dense<0.000000e+00> : vector<8x512xf32>
      %79 = tpu.matmul %68, %78, %cst_59 {dimension_numbers = #tpu.dot_dimension_numbers<[1], [0], [0], [1], [0, 0, 1, 1], [], []>} : vector<8x16xf32>, vector<16x512xf32>, vector<8x512xf32> -> vector<8x512xf32>
      %c0_60 = arith.constant 0 : index
      %c0_61 = arith.constant 0 : index
      %80 = vector.load %arg16[%c0_60, %c0_61] : memref<1x512xf32, #tpu.memory_space<vmem>>, vector<1x512xf32>
      %81 = vector.broadcast %80 : vector<1x512xf32> to vector<8x512xf32>
      %82 = arith.addf %79, %81 : vector<8x512xf32>
      %83 = tpu.transpose %67, [1, 0] : vector<8x128xf32> -> vector<128x8xf32>
      %84 = vector.extract_strided_slice %82 {offsets = [0, 0], sizes = [8, 128], strides = [1, 1]} : vector<8x512xf32> to vector<8x128xf32>
      %cst_62 = arith.constant dense<0.000000e+00> : vector<8x8xf32>
      %85 = tpu.matmul %84, %83, %cst_62 {dimension_numbers = #tpu.dot_dimension_numbers<[1], [0], [0], [1], [0, 0, 1, 1], [], []>} : vector<8x128xf32>, vector<128x8xf32>, vector<8x8xf32> -> vector<8x8xf32>
      %c0_63 = arith.constant 0 : index
      %c0_64 = arith.constant 0 : index
      %c0_65 = arith.constant 0 : index
      %c0_66 = arith.constant 0 : index
      %86 = vector.load %arg19[%c0_63, %c0_64, %c0_65, %c0_66] : memref<1x4x8x8xf32, #tpu.memory_space<vmem>>, vector<1x1x8x8xf32>
      %87 = vector.shape_cast %86 : vector<1x1x8x8xf32> to vector<8x8xf32>
      %88 = vector.shape_cast %85 : vector<8x8xf32> to vector<1x1x8x8xf32>
      tpu.vector_store %arg19[%c0_63, %c0_64, %c0_65, %c0_66], %88 {strides = array<i32>} : memref<1x4x8x8xf32, #tpu.memory_space<vmem>>, vector<1x1x8x8xf32>,
      %89 = vector.extract_strided_slice %82 {offsets = [0, 128], sizes = [8, 128], strides = [1, 1]} : vector<8x512xf32> to vector<8x128xf32>
      %cst_67 = arith.constant dense<0.000000e+00> : vector<8x8xf32>
      %90 = tpu.matmul %89, %83, %cst_67 {dimension_numbers = #tpu.dot_dimension_numbers<[1], [0], [0], [1], [0, 0, 1, 1], [], []>} : vector<8x128xf32>, vector<128x8xf32>, vector<8x8xf32> -> vector<8x8xf32>
      %c0_68 = arith.constant 0 : index
      %c1_69 = arith.constant 1 : index
      %c0_70 = arith.constant 0 : index
      %c0_71 = arith.constant 0 : index
      %91 = vector.load %arg19[%c0_68, %c1_69, %c0_70, %c0_71] : memref<1x4x8x8xf32, #tpu.memory_space<vmem>>, vector<1x1x8x8xf32>
      %92 = vector.shape_cast %91 : vector<1x1x8x8xf32> to vector<8x8xf32>
      %93 = vector.shape_cast %90 : vector<8x8xf32> to vector<1x1x8x8xf32>
      tpu.vector_store %arg19[%c0_68, %c1_69, %c0_70, %c0_71], %93 {strides = array<i32>} : memref<1x4x8x8xf32, #tpu.memory_space<vmem>>, vector<1x1x8x8xf32>,
      %94 = vector.extract_strided_slice %82 {offsets = [0, 256], sizes = [8, 128], strides = [1, 1]} : vector<8x512xf32> to vector<8x128xf32>
      %cst_72 = arith.constant dense<0.000000e+00> : vector<8x8xf32>
      %95 = tpu.matmul %94, %83, %cst_72 {dimension_numbers = #tpu.dot_dimension_numbers<[1], [0], [0], [1], [0, 0, 1, 1], [], []>} : vector<8x128xf32>, vector<128x8xf32>, vector<8x8xf32> -> vector<8x8xf32>
      %c0_73 = arith.constant 0 : index
      %c2 = arith.constant 2 : index
      %c0_74 = arith.constant 0 : index
      %c0_75 = arith.constant 0 : index
      %96 = vector.load %arg19[%c0_73, %c2, %c0_74, %c0_75] : memref<1x4x8x8xf32, #tpu.memory_space<vmem>>, vector<1x1x8x8xf32>
      %97 = vector.shape_cast %96 : vector<1x1x8x8xf32> to vector<8x8xf32>
      %98 = vector.shape_cast %95 : vector<8x8xf32> to vector<1x1x8x8xf32>
      tpu.vector_store %arg19[%c0_73, %c2, %c0_74, %c0_75], %98 {strides = array<i32>} : memref<1x4x8x8xf32, #tpu.memory_space<vmem>>, vector<1x1x8x8xf32>,
      %99 = vector.extract_strided_slice %82 {offsets = [0, 384], sizes = [8, 128], strides = [1, 1]} : vector<8x512xf32> to vector<8x128xf32>
      %cst_76 = arith.constant dense<0.000000e+00> : vector<8x8xf32>
      %100 = tpu.matmul %99, %83, %cst_76 {dimension_numbers = #tpu.dot_dimension_numbers<[1], [0], [0], [1], [0, 0, 1, 1], [], []>} : vector<8x128xf32>, vector<128x8xf32>, vector<8x8xf32> -> vector<8x8xf32>
      %c0_77 = arith.constant 0 : index
      %c3 = arith.constant 3 : index
      %c0_78 = arith.constant 0 : index
      %c0_79 = arith.constant 0 : index
      %101 = vector.load %arg19[%c0_77, %c3, %c0_78, %c0_79] : memref<1x4x8x8xf32, #tpu.memory_space<vmem>>, vector<1x1x8x8xf32>
      %102 = vector.shape_cast %101 : vector<1x1x8x8xf32> to vector<8x8xf32>
      %103 = vector.shape_cast %100 : vector<8x8xf32> to vector<1x1x8x8xf32>
      tpu.vector_store %arg19[%c0_77, %c3, %c0_78, %c0_79], %103 {strides = array<i32>} : memref<1x4x8x8xf32, #tpu.memory_space<vmem>>, vector<1x1x8x8xf32>,
    } else {
    }
    return
  }
  func.func @transform_0(%arg0: i32, %arg1: i32) -> (i32, i32) {
    %c0_i32 = arith.constant 0 : i32
    %c0_i32_0 = arith.constant 0 : i32
    %c0_i32_1 = arith.constant 0 : i32
    return %c0_i32, %c0_i32_0 : i32, i32
  }
  func.func @transform_1(%arg0: i32, %arg1: i32) -> (i32, i32, i32, i32) {
    %c0_i32 = arith.constant 0 : i32
    %c0_i32_0 = arith.constant 0 : i32
    %c0_i32_1 = arith.constant 0 : i32
    return %arg0, %arg1, %c0_i32, %c0_i32_0 : i32, i32, i32, i32
  }
  func.func @transform_2(%arg0: i32, %arg1: i32) -> (i32, i32) {
    %c0_i32 = arith.constant 0 : i32
    %c0_i32_0 = arith.constant 0 : i32
    %c0_i32_1 = arith.constant 0 : i32
    return %c0_i32, %c0_i32_0 : i32, i32
  }
  func.func @transform_3(%arg0: i32, %arg1: i32) -> (i32, i32) {
    %c0_i32 = arith.constant 0 : i32
    %c0_i32_0 = arith.constant 0 : i32
    %c0_i32_1 = arith.constant 0 : i32
    return %c0_i32, %c0_i32_0 : i32, i32
  }
  func.func @transform_4(%arg0: i32, %arg1: i32) -> (i32, i32) {
    %c0_i32 = arith.constant 0 : i32
    %c0_i32_0 = arith.constant 0 : i32
    %c0_i32_1 = arith.constant 0 : i32
    return %c0_i32, %c0_i32_0 : i32, i32
  }
  func.func @transform_5(%arg0: i32, %arg1: i32) -> (i32, i32) {
    %c0_i32 = arith.constant 0 : i32
    %c0_i32_0 = arith.constant 0 : i32
    %c0_i32_1 = arith.constant 0 : i32
    return %c0_i32, %c0_i32_0 : i32, i32
  }
  func.func @transform_6(%arg0: i32, %arg1: i32) -> (i32, i32) {
    %c0_i32 = arith.constant 0 : i32
    %c0_i32_0 = arith.constant 0 : i32
    %c0_i32_1 = arith.constant 0 : i32
    return %c0_i32, %c0_i32_0 : i32, i32
  }
  func.func @transform_7(%arg0: i32, %arg1: i32) -> (i32, i32) {
    %c0_i32 = arith.constant 0 : i32
    %c0_i32_0 = arith.constant 0 : i32
    %c0_i32_1 = arith.constant 0 : i32
    return %c0_i32, %c0_i32_0 : i32, i32
  }
  func.func @transform_8(%arg0: i32, %arg1: i32) -> (i32, i32) {
    %c0_i32 = arith.constant 0 : i32
    %c0_i32_0 = arith.constant 0 : i32
    %c0_i32_1 = arith.constant 0 : i32
    return %c0_i32, %c0_i32_0 : i32, i32
  }
  func.func @transform_9(%arg0: i32, %arg1: i32) -> (i32, i32) {
    %c0_i32 = arith.constant 0 : i32
    %c0_i32_0 = arith.constant 0 : i32
    %c0_i32_1 = arith.constant 0 : i32
    return %c0_i32, %c0_i32_0 : i32, i32
  }
  func.func @transform_10(%arg0: i32, %arg1: i32) -> (i32, i32) {
    %c0_i32 = arith.constant 0 : i32
    %c0_i32_0 = arith.constant 0 : i32
    %c0_i32_1 = arith.constant 0 : i32
    return %c0_i32, %c0_i32_0 : i32, i32
  }
  func.func @transform_11(%arg0: i32, %arg1: i32) -> (i32, i32) {
    %c0_i32 = arith.constant 0 : i32
    %c0_i32_0 = arith.constant 0 : i32
    %c0_i32_1 = arith.constant 0 : i32
    return %c0_i32, %c0_i32_0 : i32, i32
  }
  func.func @transform_12(%arg0: i32, %arg1: i32) -> (i32, i32) {
    %c0_i32 = arith.constant 0 : i32
    %c0_i32_0 = arith.constant 0 : i32
    %c0_i32_1 = arith.constant 0 : i32
    return %c0_i32, %c0_i32_0 : i32, i32
  }
  func.func @transform_13(%arg0: i32, %arg1: i32) -> (i32, i32) {
    %c0_i32 = arith.constant 0 : i32
    %c0_i32_0 = arith.constant 0 : i32
    %c0_i32_1 = arith.constant 0 : i32
    return %c0_i32, %c0_i32_0 : i32, i32
  }
  func.func @transform_14(%arg0: i32, %arg1: i32) -> (i32, i32) {
    %c0_i32 = arith.constant 0 : i32
    %c0_i32_0 = arith.constant 0 : i32
    %c0_i32_1 = arith.constant 0 : i32
    return %c0_i32, %c0_i32_0 : i32, i32
  }
  func.func @transform_15(%arg0: i32, %arg1: i32) -> (i32, i32, i32) {
    %c0_i32 = arith.constant 0 : i32
    %c0_i32_0 = arith.constant 0 : i32
    %c0_i32_1 = arith.constant 0 : i32
    return %arg0, %c0_i32, %c0_i32_0 : i32, i32, i32
  }
  func.func @transform_16(%arg0: i32, %arg1: i32) -> (i32, i32, i32) {
    %c0_i32 = arith.constant 0 : i32
    %c0_i32_0 = arith.constant 0 : i32
    %c0_i32_1 = arith.constant 0 : i32
    return %arg0, %c0_i32, %c0_i32_0 : i32, i32, i32
  }
  func.func @transform_17(%arg0: i32, %arg1: i32) -> (i32, i32, i32, i32) {
    %c0_i32 = arith.constant 0 : i32
    %c0_i32_0 = arith.constant 0 : i32
    %c0_i32_1 = arith.constant 0 : i32
    %c0_i32_2 = arith.constant 0 : i32
    return %arg0, %c0_i32, %c0_i32_0, %c0_i32_1 : i32, i32, i32, i32
  }
}

</mosaic_0001>

<bundles_post_ra>
// kernel: base_model_forward.1
= control target key start
LH: loop header
LB: loop body
LE: loop exit
PB: predicated region body
PF: predicated region fallthrough
CT: control target
= control target key end

     0   :  { %s2778_s0 = inlined_call_operand.vmem [shape: f32[2,4], index: 0, kind: input, shape index: {}]   ;;  %s2779_s1 = inlined_call_operand.vmem [shape: bf16[2,4,8,32], index: 1, kind: input, shape index: {}]   ;;  %s2780_s2 = inlined_call_operand.vmem [shape: f32[32,8], index: 2, kind: input, shape index: {}]   ;;  %s2781_s3 = inlined_call_operand.vmem [shape: f32[1,8], index: 3, kind: input, shape index: {}]   ;;  %s2782_s4 = inlined_call_operand.vmem [shape: f32[8,8], index: 4, kind: input, shape index: {}]   ;;  %s2783_s5 = inlined_call_operand.vmem [shape: f32[32,32], index: 5, kind: input, shape index: {}]   ;;  %s2784_s6 = inlined_call_operand.vmem [shape: f32[8,32], index: 6, kind: input, shape index: {}]   ;;  %s2785_s7 = inlined_call_operand.vmem [shape: f32[1,32], index: 7, kind: input, shape index: {}]   ;;  %s2786_s8 = inlined_call_operand.vmem [shape: f32[32,144], index: 8, kind: input, shape index: {}]   ;;  %s2787_s9 = inlined_call_operand.vmem [shape: f32[8,144], index: 9, kind: input, shape index: {}]   ;;  %s2788_s10 = inlined_call_operand.vmem [shape: f32[1,144], index: 10, kind: input, shape index: {}]   ;;  %s2789_s11 = inlined_call_operand.vmem [shape: f32[16,16], index: 11, kind: input, shape index: {}]   ;;  %s2790_s12 = inlined_call_operand.vmem [shape: f32[1,16], index: 12, kind: input, shape index: {}]   ;;  %s2791_s13 = inlined_call_operand.vmem [shape: f32[16,512], index: 13, kind: input, shape index: {}]   ;;  %s2792_s14 = inlined_call_operand.vmem [shape: f32[1,512], index: 14, kind: input, shape index: {}]   ;;  %s2793_s15 = inlined_call_operand.hbm [shape: f32[2,8,8], index: 15, kind: output, shape index: {0}]   ;;  %s2794_s16 = inlined_call_operand.hbm [shape: f32[2,8,8], index: 16, kind: output, shape index: {1}]   ;;  %s2795_s17 = inlined_call_operand.vmem [shape: f32[2,4,8,8], index: 17, kind: output, shape index: {2}]  }
   0x1   :  { %2812 = sst [smem:[#allocation25_spill]] %s2778_s0 }
   0x2   :  { %2813 = sst [smem:[#allocation26_spill]] %s2779_s1 }
   0x3   :  { %2814 = sst [smem:[#allocation27_spill]] %s2780_s2 }
   0x4   :  { %2815 = sst [smem:[#allocation28_spill]] %s2790_s12 }
   0x5   :  { %2816 = sst [smem:[#allocation29_spill]] %s2793_s15 }
   0x6   :  { %2817 = sst [smem:[#allocation30_spill]] %s2794_s16 }
   0x7   :  { %23 = vsyncpa [#allocation6], 0 }
   0x8   :  { %24 = vsyncpa [#allocation5], 0 }
   0x9   :  { %26 = vsyncpa [#allocation5 + $0x1], 0 }
   0xa   :  { %27 = vsyncpa [#allocation9], 0 }
   0xb   :  { %29 = vsyncpa [#allocation9 + $0x1], 0  ;;  %s2417_s24 = smov 0   ;;  %s2419_s25 = smov 0  }
   0xc   :  { %s2421_s26 = smov 0   ;;  %s2423_s27 = smov 0  }
   0xd   :  { %s2425_s28 = smov 0   ;;  %s2427_s29 = smov 0  }
   0xe   :  { %s2429_s0 = smov 0   ;;  %s2431_s30 = smov 0  }
   0xf LB: > { %2818 = sst [smem:[#allocation13_spill]] %s2290_s24  ;;  %s1949_s18 = sadd.s32 4294967295, %s2318_s30   ;;  %s2318_s30 = sphi %s2431_s30, %s35_s30   ;;  %s2314_s0 = sphi %s2429_s0, %s2854_s0   ;;  %s2310_s29 = sphi %s2427_s29, %s2853_s29   ;;  %s2306_s28 = sphi %s2425_s28, %s2852_s28   ;;  %s2302_s27 = sphi %s2423_s27, %s2851_s27   ;;  %s2298_s26 = sphi %s2421_s26, %s2850_s26   ;;  %s2294_s25 = sphi %s2419_s25, %s2849_s25   ;;  %s2290_s24 = sphi %s2417_s24, %s2848_s24  }
  0x10   : > { %2819 = sst [smem:[#allocation14_spill]] %s2294_s25  ;;  %s1950_s19 = sadd.s32 4294967294, %s2318_s30  }
  0x11   : > { %2820 = sst [smem:[#allocation15_spill]] %s2298_s26  ;;  %s44_s1 = sadd.s32 1, %s2310_s29 }
  0x12   : > { %2821 = sst [smem:[#allocation16_spill]] %s2310_s29  ;;  %s47_s20 = sadd.s32 1, %s2314_s0 }
  0x13   : > { %2822 = sst [smem:[#allocation17_spill]] %s2314_s0  ;;  %p45_p0 = scmp.ge.s32.totalorder %s44_s1, 4 }
  0x14   : > { %2823 = sst [smem:[#allocation18_spill]] %s2318_s30  ;;  %s376_s21 = sadd.s32 1, %s2298_s26 }
  0x15   : > { %p386_p1 = scmp.ne.s32.totalorder %s2298_s26, %s2294_s25  ;;  %p387_p2 = scmp.eq.s32.totalorder %s1949_s18, 7 }
  0x16   : > { %s2856_s1 = smov (%p45_p0, %s44_s1), 0  ;;  %s2858_s20 = smov (!%p45_p0, %s47_s20), %s2314_s0 }
  0x17   : > { %2824 = sst [smem:[#allocation19_spill]] %s2856_s1  ;;  %p2467_p3 = por %p387_p2, %p386_p1 }
  0x18   : > { %p392_p4 = scmp.ne.s32.totalorder %s2294_s25, %s2290_s24  ;;  %p49_p5 = scmp.ge.s32.totalorder %s2858_s20, 2 }
  0x19   : > { %s2825_s22 = scalar_select %p2467_p3, 1, 0 }
  0x1a   : > { %p393_p6 = scmp.eq.s32.totalorder %s1950_s19, 7  ;;  %p1951_p7 = scmp.ge.s32.totalorder %s2318_s30, 1 }
  0x1b   : > { %2826 = sst [smem:[#allocation20_spill]] %s2825_s22  ;;  %p452_p8 = scmp.lt.s32.totalorder %s2318_s30, 9 }
  0x1c   : > { %s2860_s20 = smov (%p49_p5, %s2858_s20), 0  ;;  %p2477_p9 = por %p393_p6, %p392_p4 }
  0x1d   : > { %2827 = sst [smem:[#allocation21_spill]] %s2860_s20  ;;  %p2481_p10 = pnand %p1951_p7, %p452_p8 }
  0x1e   : > { %s2828_s23 = scalar_select %p2477_p9, 1, 0 }
  0x1f   : > { %s373_s29 = ssub.s32 %s2314_s0, %s2860_s20  ;;  %p2090_p12 = pneg %p2481_p10 }
  0x20   : > { %2829 = sst [smem:[#allocation22_spill]] %s2828_s23  ;;  %p374_p11 = scmp.eq.s32.totalorder %s373_s29, 0 }
  0x21   : > { %p2489_p13 = scmp.eq.s32.totalorder %s1949_s18, 0  ;;  %s2832_s16 = sld [smem:[#allocation25_spill]] }
  0x22   : > { %s2497_s22 = scalar_select %p374_p11, %s2298_s26, %s376_s21  }
  0x23   : > { %p2091_p0 = pnand %p2489_p13, %p2090_p12 }
  0x24   : > { %2833 = sst [smem:[#allocation23_spill]] %s2497_s22 }
  0x25   : > { %p2179_p2 = pneg %p2091_p0 }
  0x27   : > { %s465_s15 = sshll.u32 %s2832_s16, 4  ;;  %s466_s15 = int_to_ptr.vmem [resolvable:$true] %s465_s15 }
  0x28   : > { %s2177_s23 = scalar_lea.vmem %s466_s15, 32  ;;  %p2185_p6 = scmp.lt.s32.totalorder %s466_s15, %s466_s15 }
  0x29   : > { %p2178_p1 = scmp.ne.s32.totalorder %s466_s15, %s2177_s23  ;;  %p2186_p7 = scmp.lt.s32.totalorder %s2177_s23, %s2177_s23 }
  0x2b   : > { %p2180_p4 = pnand %p2179_p2, %p2178_p1  ;;  %p2187_p8 = por %p2186_p7, %p2185_p6 }
  0x2d   : > { %p2181_p5 = pneg %p2180_p4 }
  0x2f   : > { %p2188_p9 = pnand %p2187_p8, %p2181_p5 }
  0x31   : > { %2191 = shalt.err (!%p2188_p9)
}
  0x32   : > { %s2320_s29 = smov [#allocation4]   ;;  %528 = sbr.rel (%p2481_p10) target bundleno = 1765 (0x6e5), region = 80 }
  0x33   : > { %2093 = dma.vmem_to_smem (!%p2091_p0), %s466_s15, 32, %s2320_s29, [#allocation6]  }
  0x37   : > { %2277 = dma.done.wait (%p2489_p13), [#allocation6], 32  }
  0x38   : > { %2279 = vsyncadd (%p2489_p13), [#allocation6], 4294967264 }
  0x39   : > { %534 = sfence }
  0x3a   : > { %s2508_s16 = sand.u32 1, %s2294_s25   ;;  %p594_p9 = scmp.lt.s32.totalorder %s2306_s28, 1 }
  0x3b   : > { %2834 = sst [smem:[#allocation24_spill]] %s2508_s16  ;;  %s1956_s15 = sshll.u32 %s2508_s16, 3 }
  0x3c   : > { %p596_p11 = scmp.lt.s32.totalorder %s2302_s27, 3  ;;  %s2835_s26 = sld [smem:[#allocation26_spill]] }
  0x3d   : > { %s595_s24 = scalar_select %p594_p9, %s2306_s28, 1 }
  0x3e   : > { %s597_s30 = scalar_select %p596_p11, %s2302_s27, 3 }
  0x3f   : > { %s1958_s18 = sshll.u32 %s595_s24, 2  ;;  %s1988_s1 = sshll.u32 %s595_s24, 5 }
  0x40   : > { %s599_s21 = sadd.s32 %s1958_s18, %s597_s30  ;;  %s2518_s29 = scalar_lea.vmem %s2795_s17, %s1988_s1 }
  0x41   : > { %s1959_s20 = sshll.u32 %s599_s21, 2  ;;  %s2523_s12 = scalar_lea.vmem [#allocation7], %s1956_s15 }
  0x42   : > { %s601_s25 = scalar_lea.vmem %s2835_s26, %s1959_s20  ;;  %s2525_s16 = scalar_lea.vmem [#allocation8], %s1956_s15 }
  0x43   : > { %v607_v0 = vld [vmem:[%s601_s25] sm:$0xf]  ;;  %p1962_p10 = scmp.ne.s32.totalorder %s2302_s27, 0 }
  0x44   : > { %v608_v1 = vunpack.c.l.bf16 %v607_v0 }
  0x45   : > { %612 = sbr.rel (%p1962_p10) target bundleno = 76 (0x4c), region = 88 }
  0x4a   : > { %vm613_vm0 = vcmask 261120   ;;  %v2321_v2 = vmov 0.0  }
  0x4b   : > { %614 = vst.msk [vmem:[#allocation2] sm:$0xff] %vm613_vm0, %v2321_v2  ;;  %615 = vst.msk [vmem:[#allocation3] sm:$0xff] %vm613_vm0, %v2321_v2 }
  0x4c PF: > { %s617_s24 = sld [smem:[#allocation4 + %s2302_s27]]  ;;  %s624_s0 = sshra.s32 %s2302_s27, 7  ;;  %vm621_vm1 = vcmask 261120  }
  0x4d   : > { %s1989_s26 = sshll.u32 %s624_s0, 7  ;;  %s629_s25 = sand.u32 127, %s2302_s27 }
  0x4e   : > { %s1990_s20 = sadd.s32 128, %s1989_s26  ;;  %p1964_p12 = scmp.ne.s32.totalorder %s2302_s27, 3 }
  0x4f   : > { %s630_s22 = sadd.s32 %s1990_s20, %s629_s25  ;;  %s2836_s2 = sld [smem:[#allocation27_spill]] (!%p1964_p12) }
  0x50   : > { %s631_s30 = sld [smem:[#allocation4 + %s630_s22]]  ;;  %s2324_s1 = smov (!%p1964_p12), 112  }
  0x52   : > { %v616_v3 = vld [vmem:[#allocation2] sm:$0xff]  ;;  %v618_v4 = vstv %s617_s24  ;;  %v623_v7 = vld [vmem:[#allocation3] sm:$0xff]  ;;  %s2837_s24 = sld [smem:[#allocation28_spill]] (!%p1964_p12) }
  0x53   : > { %v619_v5 = vmul.f32 %v618_v4, %v608_v1 }
  0x55   : > { %v620_v6 = vadd.f32 %v619_v5, %v616_v3 }
  0x56   : > { %v632_v8 = vstv %s631_s30 }
  0x57   : > { %622 = vst.msk [vmem:[#allocation2] sm:$0xff] %vm621_vm1, %v620_v6  ;;  %v633_v9 = vmul.f32 %v632_v8, %v608_v1  ;;  %639 = sbr.rel (%p1964_p12) target bundleno = 1718 (0x6b6), region = 92 }
  0x59   : > { %v634_v10 = vadd.f32 %v633_v9, %v623_v7 }
  0x5b   : > { %635 = vst.msk [vmem:[#allocation3] sm:$0xff] %vm621_vm1, %v634_v10 }
  0x5c   : > { %v645_v11 = vld [vmem:[%s2836_s2 + $0x18] sm:$0xff]  ;;  %v2322_v12 = vmov 0.0   ;;  %v644_v13 = vld [vmem:[%s2836_s2 + $0x10] sm:$0xff]  ;;  %vm2323_vm2 = vmmov 0   ;;  %v643_v14 = vld [vmem:[%s2836_s2 + $0x8] sm:$0xff]  ;;  %vm726_vm3 = vcmask 64512   ;;  %v1127_v55 = vlaneseq }
  0x5d   : > { %2018 = vmatprep.subr.mxu0 %v2322_v12  ;;  %2026 = vmatprep.mubr.msk.f32.mxu0 %vm2323_vm2, %v2322_v12  ;;  %v642_v15 = vld [vmem:[%s2836_s2] sm:$0xff]  ;;  %v982_v28 = vld [vmem:[%s2787_s9 + $0x8] sm:$0xff]  ;;  %v980_v34 = vld [vmem:[%s2786_s8 + $0x38] sm:$0xff]  ;;  %vm1153_vm4 = vcmask 130048  }
  0x5e   : > { %2019 = vmatpush3.msra.mxu0 %v645_v11  ;;  %2029 = vmatprep.subr.mxu1 %v2322_v12  ;;  %v640_v16 = vld [vmem:[#allocation2] sm:$0xff]  ;;  %v816_v35 = vld [vmem:[%s2783_s5 + $0x18] sm:$0xff]  ;;  %v979_v36 = vld [vmem:[%s2786_s8 + $0x30] sm:$0xff]  ;;  %v2652_v57 = vshrl.u32 %v1127_v55, 7 }
  0x5f   : > { %2020 = vmatprep.subr.mxu0 %v2322_v12  ;;  %2031 = vmatprep.mubr.msk.f32.mxu1 %vm2323_vm2, %v2322_v12  ;;  %v1965_v17 = vld [vmem:[%s2781_s3] ss:$0 sm:$0xff]  ;;  %v978_v38 = vld [vmem:[%s2786_s8 + $0x28] sm:$0xff]  ;;  %v815_v39 = vld [vmem:[%s2783_s5 + $0x10] sm:$0xff] }
  0x60   : > { %2021 = vmatpush3.msra.mxu0 %v644_v13  ;;  %v739_v27 = vld [vmem:[%s2782_s4] sm:$0xff]  ;;  %v976_v42 = vld [vmem:[%s2786_s8 + $0x18] sm:$0xff]  ;;  %v814_v43 = vld [vmem:[%s2783_s5 + $0x8] sm:$0xff]  ;;  %v1129_v60 = vsub.s32 0, %v2652_v57  ;;  %v1133_v62 = vsub.s32 1, %v2652_v57 }
  0x61   : > { %2022 = vmatprep.subr.mxu0 %v2322_v12  ;;  %2030 = vmatpush3.msra.mxu1 %v739_v27  ;;  %v981_v29 = vld [vmem:[%s2787_s9] sm:$0xff]  ;;  %v975_v44 = vld [vmem:[%s2786_s8 + $0x10] sm:$0xff]  ;;  %v974_v45 = vld [vmem:[%s2786_s8 + $0x8] sm:$0xff] }
  0x62   : > { %2023 = vmatpush3.msra.mxu0 %v643_v14  ;;  %2034 = vmatprep.subr.mxu1 %v2322_v12  ;;  %v817_v33 = vld [vmem:[%s2784_s6] sm:$0xff]  ;;  %v641_v48 = vld [vmem:[#allocation3] sm:$0xff]  ;;  %v1308_v27 = vld [vmem:[%s2791_s13 + $0x30] sm:$0xff] }
  0x63   : > { %2024 = vmatprep.subr.mxu0 %v2322_v12  ;;  %v977_v40 = vld [vmem:[%s2786_s8 + $0x20] sm:$0xff]  ;;  %v1307_v49 = vld [vmem:[%s2791_s13 + $0x28] sm:$0xff] }
  0x64   : > { %2025 = vmatpush3.msra.mxu0 %v642_v15  ;;  %v813_v46 = vld [vmem:[%s2783_s5] sm:$0xff]  ;;  %v1303_v51 = vld [vmem:[%s2791_s13 + $0x8] sm:$0xff] }
  0x65   : > { %2027 = vmatmul.mubr.msk.f32.vlgmr.msra.gmra.mxu0 %vm621_vm1, %v640_v16  ;;  %1013 = vmatprep.subr.mxu0 %v982_v28  ;;  %v973_v47 = vld [vmem:[%s2786_s8] sm:$0xff]  ;;  %v1142_v53 = vld [vmem:[%s2789_s11 + $0x8] sm:$0xff]  ;;  %v1305_v28 = vld [vmem:[%s2791_s13 + $0x18] sm:$0xff] }
  0x66   : > { %1047 = vmatprep.mubr.f32.mxu0 %v2322_v12  ;;  %1014 = vmatpush1.msra.mxu0 %v981_v29  ;;  %v1306_v50 = vld [vmem:[%s2791_s13 + $0x20] sm:$0xff]  ;;  %v1304_v29 = vld [vmem:[%s2791_s13 + $0x10] sm:$0xff] }
  0x67   : > { %1078 = vmatprep.subr.mxu0 %v980_v34  ;;  %v1302_v52 = vld [vmem:[%s2791_s13] sm:$0xff] }
  0x68   : > { %v1141_v54 = vld [vmem:[%s2789_s11] sm:$0xff] }
  0x69   : > { %v1125_v61 = vld [vmem:[%s2788_s10] sm:$0x3] }
  0x6a   : > { %v1130_v2 = vrot.slane %v1125_v61, %v1129_v60  ;;  %v1970_v3 = vld [vmem:[%s2785_s7] ss:$0 sm:$0xff]  ;;  %v1134_v6 = vrot.slane %v1125_v61, %v1133_v62 }
 0x125   : > { %v722_v18 = vpop.f32.mrf.mxu0 }
 0x126   : > { %v723_v19 = vadd.f32 %v1965_v17, %v722_v18  ;;  %v1310_v18 = vld [vmem:[%s2792_s14] sm:$0xf] }
 0x127   : > { %v2028_v20 = vpop.f32.mrf.mxu0 }
 0x128   : > { %727 = vst.msk [vmem:[%s2523_s12] sm:$0xff] %vm726_vm3, %v723_v19  ;;  %v728_v21 = vsel %vm726_vm3, %v723_v19, -inf }
 0x129   : > { %729 = vmax.xlane.f32.xlu0 %v728_v21 }
 0x1b2   : > { %v730_v22 = vpop.xlane.xlu0 %729 }
 0x1b3   : > { %v731_v23 = vsub.f32 %v723_v19, %v730_v22  ;;  %v1315_v19 = vrot.slane %v1310_v18, %v1129_v60  ;;  %v1973_v22 = vld [vmem:[%s2837_s24] ss:$0 sm:$0xff] }
 0x1b5   : > { %v732_v24 = vmul.f32 1.442695, %v731_v23 }
 0x1b7   : > { %2173 = vpow2.f32 %v732_v24 }
 0x1c4   : > { %v2174_v25 = vpop.eup %2173 }
 0x1c5   : > { %v734_v26 = vsel %vm726_vm3, %v2174_v25, 0.0 }
 0x1c6   : > { %735 = vadd.xlane.f32.xlu0 %v734_v26 }
 0x24f   : > { %v736_v30 = vpop.xlane.xlu0 %735 }
 0x250   : > { %2175 = vrcp.f32 %v736_v30  ;;  %v1319_v30 = vrot.slane %v1310_v18, %v1133_v62 }
 0x25d   : > { %v2176_v31 = vpop.eup %2175 }
 0x25e   : > { %v738_v32 = vmul.f32 %v2176_v31, %v2174_v25  ;;  %v1309_v25 = vld [vmem:[%s2791_s13 + $0x38] sm:$0xff] }
 0x260   : > { %2032 = vmatmul.mubr.msk.f32.vlgmr.msra.gmra.mxu1 %vm726_vm3, %v738_v32 }
 0x261   : > { %2035 = vmatpush3.msra.mxu1 %v817_v33  ;;  %2036 = vmatprep.mubr.msk.f32.mxu1 %vm2323_vm2, %v2322_v12 }
 0x262   : > { %2039 = vmatprep.subr.mxu1 %v2322_v12 }
 0x320   : > { %v809_v37 = vpop.f32.mrf.mxu1 }
 0x321   : > { %2037 = vmatmul.mubr.msk.f32.vlgmr.msra.gmra.mxu1 %vm726_vm3, %v809_v37  ;;  %1971 = vmatmul.mubr.msk.f32.vlgmr.msra.gmra.mxu0 %vm726_vm3, %v809_v37 }
 0x322   : > { %2040 = vmatpush3.msra.mxu1 %v816_v35  ;;  %1079 = vmatpush1.msra.mxu0 %v979_v36  ;;  %v2033_v41 = vpop.f32.mrf.mxu1  ;;  %v1322_v35 = vsub.s32 2, %v2652_v57  ;;  %v1326_v36 = vsub.s32 3, %v2652_v57 }
 0x323   : > { %2041 = vmatprep.subr.mxu1 %v2322_v12  ;;  %1080 = vmatprep.subr.mxu0 %v978_v38 }
 0x324   : > { %2042 = vmatpush3.msra.mxu1 %v815_v39  ;;  %1081 = vmatpush1.msra.mxu0 %v977_v40  ;;  %v1323_v38 = vrot.slane %v1310_v18, %v1322_v35  ;;  %v1327_v40 = vrot.slane %v1310_v18, %v1326_v36 }
 0x325   : > { %2043 = vmatprep.subr.mxu1 %v2322_v12  ;;  %1082 = vmatprep.subr.mxu0 %v976_v42 }
 0x326   : > { %2044 = vmatpush3.msra.mxu1 %v814_v43  ;;  %1083 = vmatpush1.msra.mxu0 %v975_v44 }
 0x327   : > { %2045 = vmatprep.subr.mxu1 %v2322_v12  ;;  %1084 = vmatprep.subr.mxu0 %v974_v45 }
 0x328   : > { %2046 = vmatpush3.msra.mxu1 %v813_v46  ;;  %2047 = vmatprep.mubr.msk.f32.mxu1 %vm2323_vm2, %v2322_v12 }
 0x329   : > { %1085 = vmatpush1.msra.mxu0 %v973_v47  ;;  %1118 = vmatprep.mubr.f32.mxu0 %v2322_v12 }
 0x32a   : > { %2048 = vmatmul.mubr.msk.f32.vlgmr.msra.gmra.mxu1 %vm621_vm1, %v641_v48  ;;  %1972 = vmatmul.mubr.msk.f32.vlgmr.msra.gmra.mxu0 %vm621_vm1, %v641_v48 }
 0x32b   : > { %1399 = vmatprep.mubr.f32.mxu0 %v2322_v12  ;;  %2050 = vmatprep.subr.mxu1 %v2322_v12 }
 0x32c   : > { %2054 = vmatprep.mubr.msk.f32.mxu1 %vm2323_vm2, %v2322_v12  ;;  %1363 = vmatprep.subr.mxu0 %v1307_v49 }
 0x32d   : > { %1364 = vmatpush1.msra.mxu0 %v1306_v50  ;;  %2051 = vmatpush3.msra.mxu1 %v1142_v53 }
 0x32e   : > { %1365 = vmatprep.subr.mxu0 %v1303_v51  ;;  %2052 = vmatprep.subr.mxu1 %v2322_v12 }
 0x32f   : > { %1366 = vmatpush1.msra.mxu0 %v1302_v52  ;;  %2053 = vmatpush3.msra.mxu1 %v1141_v54 }
 0x330   : > { %2062 = vmatprep.subr.mxu0 %v2322_v12  ;;  %2057 = vmatprep.subr.mxu1 %v2322_v12 }
 0x3e1   : > { %v887_v56 = vpop.f32.mrf.mxu1  ;;  %v1049_v59 = vpop.f32.mrf.mxu0 }
 0x3e3   : > { %v2038_v58 = vpop.f32.mrf.mxu1  ;;  %v1051_v63 = vpop.f32.mrf.mxu0 }
 0x3ea   : > { %v960_v0 = vpop.f32.mrf.mxu1  ;;  %v1120_v1 = vpop.f32.mrf.mxu0 }
 0x3eb   : > { %v961_v4 = vadd.f32 %v960_v0, %v887_v56  ;;  %v1121_v5 = vadd.f32 %v1120_v1, %v1049_v59 }
 0x3ec   : > { %v2049_v7 = vpop.f32.mrf.mxu1  ;;  %v1122_v8 = vpop.f32.mrf.mxu0 }
 0x3ed   : > { %v1123_v9 = vadd.f32 %v1122_v8, %v1051_v63  ;;  %v971_v10 = vadd.f32 %v1970_v3, %v961_v4  ;;  %v1137_v11 = vadd.f32 %v1130_v2, %v1121_v5 }
 0x3ef   : > { %v1138_v13 = vadd.f32 %v1134_v6, %v1123_v9  ;;  %v972_v14 = vmax.f32 %v971_v10, 0.0  ;;  %v1139_v16 = vmax.f32 %v1137_v11, 0.0 }
 0x3f1   : > { %v1140_v15 = vmax.f32 %v1138_v13, 0.0  ;;  %1151 = vrot.lane.b32.xlu1 %v972_v14, %s2324_s1 }
 0x3f3   : > { %1977 = vmatmul.mubr.msk.f32.vlgmr.msra.gmra.mxu0 %vm1153_vm4, %v1140_v15 }
 0x3f4   : > { %2063 = vmatpush3.xpose.msra.mxu0 %v1139_v16  ;;  %2064 = vmatprep.mubr.msk.f32.mxu0 %vm2323_vm2, %v2322_v12 }
 0x3f5   : > { %2072 = vmatprep.subr.mxu0 %v2322_v12 }
 0x463   : > { %v1152_v17 = vpop.permute.xlu1 %1151 }
 0x464   : > { %2055 = vmatmul.mubr.msk.f32.vlgmr.msra.gmra.mxu1 %vm1153_vm4, %v1152_v17 }
 0x465   : > { %2059 = vmatprep.mubr.msk.f32.mxu1 %vm2323_vm2, %v2322_v12 }
 0x4b3   : > { %v1401_v20 = vpop.f32.mrf.mxu0 }
 0x4b4   : > { %v1402_v21 = vadd.f32 %v1401_v20, %v1315_v19 }
 0x4b5   : > { %v1403_v31 = vpop.f32.mrf.mxu0 }
 0x4b6   : > { %2065 = vmatmul.mubr.f32.vlgmr.msra.gmra.mxu0 %v1402_v21  ;;  %v1404_v32 = vadd.f32 %v1403_v31, %v1319_v30 }
 0x4b7   : > { %2073 = vmatpush3.xpose.msra.mxu0 %v1139_v16  ;;  %2074 = vmatprep.mubr.msk.f32.mxu0 %vm2323_vm2, %v2322_v12 }
 0x524   : > { %v1222_v23 = vpop.f32.mrf.mxu1 }
 0x525   : > { %v1223_v24 = vadd.f32 %v1973_v22, %v1222_v23 }
 0x526   : > { %v2056_v26 = vpop.f32.mrf.mxu1 }
 0x527   : > { %2058 = vmatpush3.xpose.msk.msra.mxu1 %vm1153_vm4, %v1223_v24 }
 0x528   : > { %1434 = vmatprep.subr.mxu1 %v1309_v25 }
 0x52a   : > { %2060 = vmatmul.mubr.msk.f32.vlgmr.msra.gmra.mxu1 %vm1153_vm4, %v972_v14 }
 0x52b   : > { %1435 = vmatpush1.msra.mxu1 %v1308_v27  ;;  %1470 = vmatprep.mubr.f32.mxu1 %v2322_v12 }
 0x52c   : > { %1436 = vmatprep.subr.mxu1 %v1305_v28 }
 0x52d   : > { %1437 = vmatpush1.msra.mxu1 %v1304_v29 }
 0x52e   : > { %1978 = vmatmul.mubr.msk.f32.vlgmr.msra.gmra.mxu1 %vm1153_vm4, %v1140_v15  ;;  %2067 = vmatprep.subr.mxu1 %v2322_v12 }
 0x52f   : > { %2068 = vmatpush3.xpose.msra.mxu1 %v1139_v16  ;;  %2069 = vmatprep.mubr.msk.f32.mxu1 %vm2323_vm2, %v2322_v12 }
 0x530   : > { %2077 = vmatprep.subr.mxu1 %v2322_v12 }
 0x532   : > { %2070 = vmatmul.mubr.f32.vlgmr.msra.gmra.mxu1 %v1404_v32 }
 0x533   : > { %2078 = vmatpush3.xpose.msra.mxu1 %v1139_v16  ;;  %2079 = vmatprep.mubr.msk.f32.mxu1 %vm2323_vm2, %v2322_v12 }
 0x576   : > { %v1543_v33 = vpop.f32.mrf.mxu0 }
 0x577   : > { %1547 = vst.msk [vmem:[%s2518_s29] sm:$0xff] %vm726_vm3, %v1543_v33 }
 0x578   : > { %v2066_v34 = vpop.f32.mrf.mxu0 }
 0x5ea   : > { %v1297_v37 = vpop.f32.mrf.mxu1 }
 0x5eb   : > { %1301 = vst.msk [vmem:[%s2525_s16] sm:$0xff] %vm726_vm3, %v1297_v37 }
 0x5ec   : > { %v2061_v39 = vpop.f32.mrf.mxu1 }
 0x5ee   : > { %v1472_v41 = vpop.f32.mrf.mxu1 }
 0x5ef   : > { %v1473_v42 = vadd.f32 %v1472_v41, %v1323_v38 }
 0x5f0   : > { %v1474_v12 = vpop.f32.mrf.mxu1 }
 0x5f1   : > { %v1475_v43 = vadd.f32 %v1474_v12, %v1327_v40  ;;  %2075 = vmatmul.mubr.f32.vlgmr.msra.gmra.mxu0 %v1473_v42 }
 0x5f2   : > { %v1614_v44 = vpop.f32.mrf.mxu1 }
 0x5f3   : > { %1979 = vst.msk [vmem:[%s2518_s29 + $0x8] sm:$0xff] %vm726_vm3, %v1614_v44  ;;  %2080 = vmatmul.mubr.f32.vlgmr.msra.gmra.mxu1 %v1475_v43 }
 0x5f4   : > { %v2071_v45 = vpop.f32.mrf.mxu1 }
 0x6b1   : > { %v1686_v46 = vpop.f32.mrf.mxu0 }
 0x6b2   : > { %1980 = vst.msk [vmem:[%s2518_s29 + $0x10] sm:$0xff] %vm726_vm3, %v1686_v46 }
 0x6b3   : > { %v2076_v47 = vpop.f32.mrf.mxu0  ;;  %v1758_v48 = vpop.f32.mrf.mxu1 }
 0x6b4   : > { %1981 = vst.msk [vmem:[%s2518_s29 + $0x18] sm:$0xff] %vm726_vm3, %v1758_v48 }
 0x6b5   : > { %v2081_v49 = vpop.f32.mrf.mxu1 }
 0x6b6 PF: > { %s2838_s1 = sld [smem:[#allocation24_spill]]  ;;  %s2811_s27 = sshll.u32 %s2306_s28, 7 }
 0x6b7   : > { %s2840_s24 = sld [smem:[#allocation29_spill]]  ;;  %s1788_s26 = sshll.u32 %s2523_s12, 4  ;;  %s1789_s26 = int_to_ptr.vmem [resolvable:$true] %s1788_s26 }
 0x6b8   : > { %s2192_s22 = scalar_lea.vmem %s1789_s26, 128  ;;  %s2325_s29 = smov [#allocation7]  }
 0x6b9   : > { %p2193_p13 = scmp.ne.s32.totalorder %s1789_s26, %s2192_s22  ;;  %s2196_s30 = sshll.u32 %s2325_s29, 4  ;;  %s2197_s30 = int_to_ptr.vmem [resolvable:$false] %s2196_s30 }
 0x6ba   : > { %s2198_s15 = scalar_lea.vmem %s2197_s30, 256  ;;  %p2199_p2 = scmp.lt.s32.totalorder %s1789_s26, %s2197_s30 }
 0x6bb   : > { %p2194_p0 = pnand %p2193_p13, %p2467_p3  ;;  %p2200_p4 = scmp.lt.s32.totalorder %s2198_s15, %s2192_s22 }
 0x6bc   : > { %s1765_s25 = scalar_lea.sflag [#allocation5], %s2838_s1 }
 0x6bd   : > { %s2841_s20 = smov %s2840_s24  ;;  %s1786_s0 = scalar_lea.hbm %s2840_s24, %s2811_s27 }
 0x6be   : > { %p2195_p1 = pneg %p2194_p0  ;;  %p2201_p5 = por %p2200_p4, %p2199_p2 }
 0x6c0   : > { %p2202_p6 = pnand %p2201_p5, %p2195_p1 }
 0x6c2   : > { %2205 = shalt.err (!%p2202_p6)
}
 0x6c3   : > { %s2206_s18 = scalar_lea.hbm %s1786_s0, 128  ;;  %s2210_s19 = scalar_lea.hbm %s2841_s20, 256 }
 0x6c4   : > { %p2207_p7 = scmp.ne.s32.totalorder %s1786_s0, %s2206_s18  ;;  %p2211_p11 = scmp.lt.s32.totalorder %s1786_s0, %s2841_s20 }
 0x6c5   : > { %p2212_p10 = scmp.lt.s32.totalorder %s2210_s19, %s2206_s18 }
 0x6c6   : > { %p2208_p8 = pnand %p2207_p7, %p2467_p3 }
 0x6c7   : > { %p2213_p12 = por %p2212_p10, %p2211_p11 }
 0x6c8   : > { %p2209_p9 = pneg %p2208_p8 }
 0x6ca   : > { %p2214_p13 = pnand %p2213_p12, %p2209_p9 }
 0x6cc   : > { %2217 = shalt.err (!%p2214_p13)
}
 0x6cd   : > { %2086 = dma.vmem_to_hbm [thread:$0]  (%p2467_p3), %s1789_s26, 128, %s1786_s0, %s1765_s25  }
 0x6ce   : > { %s2842_s22 = sshll.u32 %s2306_s28, 7  ;;  %s2843_s15 = sld [smem:[#allocation30_spill]] }
 0x6cf   : > { %s1801_s23 = sshll.u32 %s2525_s16, 4  ;;  %s1770_s27 = scalar_lea.sflag [#allocation9], %s2838_s1  ;;  %s1802_s23 = int_to_ptr.vmem [resolvable:$true] %s1801_s23 }
 0x6d0   : > { %s2218_s24 = scalar_lea.vmem %s1802_s23, 128  ;;  %s2326_s18 = smov [#allocation8]  }
 0x6d1   : > { %p2219_p0 = scmp.ne.s32.totalorder %s1802_s23, %s2218_s24  ;;  %s2222_s19 = sshll.u32 %s2326_s18, 4  ;;  %s2223_s19 = int_to_ptr.vmem [resolvable:$false] %s2222_s19 }
 0x6d2   : > { %s2224_s2 = scalar_lea.vmem %s2223_s19, 256  ;;  %p2225_p4 = scmp.lt.s32.totalorder %s1802_s23, %s2223_s19 }
 0x6d3   : > { %p2220_p1 = pnand %p2219_p0, %p2467_p3  ;;  %p2226_p5 = scmp.lt.s32.totalorder %s2224_s2, %s2218_s24 }
 0x6d4   : > { %s1799_s12 = scalar_lea.hbm %s2843_s15, %s2842_s22 }
 0x6d5   : > { %p2221_p2 = pneg %p2220_p1  ;;  %p2227_p6 = por %p2226_p5, %p2225_p4 }
 0x6d7   : > { %p2228_p7 = pnand %p2227_p6, %p2221_p2 }
 0x6d9   : > { %2231 = shalt.err (!%p2228_p7)
}
 0x6da   : > { %s2232_s28 = scalar_lea.hbm %s1799_s12, 128  ;;  %s2236_s0 = scalar_lea.hbm %s2843_s15, 256 }
 0x6db   : > { %p2233_p8 = scmp.ne.s32.totalorder %s1799_s12, %s2232_s28  ;;  %p2237_p10 = scmp.lt.s32.totalorder %s1799_s12, %s2843_s15 }
 0x6dc   : > { %p2238_p12 = scmp.lt.s32.totalorder %s2236_s0, %s2232_s28 }
 0x6dd   : > { %p2234_p9 = pnand %p2233_p8, %p2467_p3 }
 0x6de   : > { %p2239_p13 = por %p2238_p12, %p2237_p10 }
 0x6df   : > { %p2235_p11 = pneg %p2234_p9 }
 0x6e1   : > { %p2240_p0 = pnand %p2239_p13, %p2235_p11 }
 0x6e3   : > { %2243 = shalt.err (!%p2240_p0)
}
 0x6e4   : > { %2087 = dma.vmem_to_hbm [thread:$0]  (%p2467_p3), %s1802_s23, 128, %s1799_s12, %s1770_s27  }
 0x6e5 PF: > { %s2844_s2 = sld [smem:[#allocation18_spill]] }
 0x6e6   : > { %s2845_s22 = sld [smem:[#allocation13_spill]] }
 0x6e7   : > { %s2846_s29 = sld [smem:[#allocation22_spill]] }
 0x6eb   : > { %p2103_p1 = scmp.ge.s32.totalorder %s2844_s2, 2 }
 0x6ec   : > { %s1816_s30 = sand.u32 1, %s2845_s22  }
 0x6ed   : > { %p2847_p2 = scmp.ne.s32.totalorder %s2846_s29, 0  ;;  %s1817_s24 = scalar_lea.sflag [#allocation5], %s1816_s30 }
 0x6ef   : > { %p2095_p4 = pnand %p2103_p1, %p2847_p2 }
 0x6f1   : > { %p2096_p5 = pneg %p2095_p4 }
 0x6f3   : > { %2281 = dma.done.wait (%p2096_p5), %s1817_s24, 128  }
 0x6f4   : > { %2283 = vsyncadd (%p2096_p5), %s1817_s24, 4294967168  ;;  %s1826_s18 = scalar_lea.sflag [#allocation9], %s1816_s30 }
 0x6f5   : > { %2285 = dma.done.wait (%p2096_p5), %s1826_s18, 128  }
 0x6f6   : > { %2287 = vsyncadd (%p2096_p5), %s1826_s18, 4294967168  ;;  %s35_s30 = sadd.s32 1, %s2844_s2   ;;  %s2848_s24 = sld [smem:[#allocation14_spill]] }
 0x6f7   : > { %p32_p6 = scmp.ge.s32.totalorder %s35_s30, 10   ;;  %s2849_s25 = sld [smem:[#allocation15_spill]] }
 0x6f8   : > { %s2850_s26 = sld [smem:[#allocation23_spill]] }
 0x6f9   : > { %s2851_s27 = sld [smem:[#allocation16_spill]]  ;;  %34 = sbr.rel (!%p32_p6) target bundleno = 15 (0xf), region = 160 }
 0x6fa   : > { %s2852_s28 = sld [smem:[#allocation17_spill]] }
 0x6fb   : > { %s2853_s29 = sld [smem:[#allocation19_spill]] }
 0x6fc   : > { %s2854_s0 = sld [smem:[#allocation21_spill]] }
 0x6fe   :  { %1839 = vsyncpa [#allocation5], 1 }
 0x6ff   :  { %1841 = vsyncpa [#allocation5 + $0x1], 1 }
 0x700   :  { %1842 = vsyncpa [#allocation9], 1 }
 0x701   :  { %1844 = vsyncpa [#allocation9 + $0x1], 1 }
 0x702   :  { %1845 = vsyncpa [#allocation6], 1 }
 0x703   :  { %1847 = vsyncpa [#allocation6 + $0x1], 1 }

</bundles_post_ra>
